<compile_context>
chip_gen: v5e
topology: v5e:2x2
jax: 0.10.0
libtpu: 0.0.40
codegen_flags: <defaults>
</compile_context>

<pallas_src>
import functools

import jax
import jax.numpy as jnp
from jax.experimental import pallas as pl
from jax.experimental.pallas import tpu as pltpu


def _largest_divisor_leq(n, cap):
    cap = max(1, min(n, cap))
    for d in range(cap, 0, -1):
        if n % d == 0:
            return d
    return 1


def _pool_kernel(x_ref, o_ref, acc_ref, *, hw, t_s, acc_lanes, needs_mask):
    s_idx = pl.program_id(1)
    last = pl.num_programs(1) - 1

    @pl.when(s_idx == 0)
    def _init():
        acc_ref[...] = jnp.zeros_like(acc_ref)

    def accumulate(x):
        # Fold a (T_N, C, T_S) tile into the fixed-width (T_N, C, acc_lanes)
        # f32 accumulator with static lane-slice adds (pure VPU work).
        x = x.astype(jnp.float32)
        n_full = t_s // acc_lanes
        for i in range(n_full):
            acc_ref[...] += x[:, :, i * acc_lanes:(i + 1) * acc_lanes]
        tail = t_s - n_full * acc_lanes
        if tail:  # only possible in the single-chunk (full-extent) case
            acc_ref[:, :, :tail] += x[:, :, n_full * acc_lanes:]

    if needs_mask:
        # Steady-state chunks: plain adds, no masking overhead.
        @pl.when(s_idx != last)
        def _steady():
            accumulate(x_ref[...])

        # Only the final (partial) chunk pays the iota/compare/select.
        @pl.when(s_idx == last)
        def _masked_last():
            x = x_ref[...]
            lane = jax.lax.broadcasted_iota(jnp.int32, x.shape, 2)
            valid = (s_idx * t_s + lane) < hw
            accumulate(jnp.where(valid, x, jnp.zeros_like(x)))
    else:
        accumulate(x_ref[...])

    @pl.when(s_idx == last)
    def _finalize():
        # One cross-lane reduce per batch group; divide by the TRUE H*W.
        pooled = jnp.sum(acc_ref[...], axis=-1) * (1.0 / hw)          # (T_N, C)
        o_ref[...] = pooled.reshape(o_ref.shape).astype(o_ref.dtype)


def _mlp_kernel(s_ref, w1_ref, b1_ref, w2_ref, b2_ref, o_ref):
    # Excitation MLP on the whole pooled batch at once (MXU M = N).
    s = s_ref[...]                                                    # (N, C)
    h = jnp.dot(s, w1_ref[...], preferred_element_type=jnp.float32) + b1_ref[...]
    h = h * jax.nn.sigmoid(h)                                         # Swish
    z = jnp.dot(h, w2_ref[...], preferred_element_type=jnp.float32) + b2_ref[...]
    o_ref[...] = jax.nn.sigmoid(z).astype(o_ref.dtype)


def se_block(x, w1, b1, w2, b2):
    """x: (N, C, H, W).  w1: (C, Cr), b1: (1, Cr), w2: (Cr, C), b2: (1, C).

    Weights are stored (in, out) — transposed relative to PyTorch nn.Linear —
    so the kernel does plain s @ w.  Returns the (N, C, 1, 1) gate.
    """
    N, C, H, W = x.shape
    HW = H * W
    bpe = x.dtype.itemsize
    x_flat = x.reshape(N, C, HW)

    # ---- hardware-derived budgets -------------------------------------------
    try:
        vmem_cap = int(pltpu.get_tpu_info().vmem_capacity_bytes)
    except Exception:
        vmem_cap = 128 * 1024 * 1024
    is_small_vmem = vmem_cap <= 64 * 1024 * 1024      # v7x-class: big HBM, small VMEM
    target_tile_bytes = (4 if is_small_vmem else 2) * 1024 * 1024
    vmem_budget_cap = max(16 * 1024 * 1024, vmem_cap - 16 * 1024 * 1024)

    # ---- tile selection -------------------------------------------------------
    row_full_bytes = C * HW * bpe                     # one batch row, full spatial
    if row_full_bytes >= target_tile_bytes:
        # Big rows: one batch row per tile, lane-dense spatial chunks by bytes.
        t_n = 1
        lanes_target = max(128, target_tile_bytes // max(1, C * bpe))
        t_s = min(HW, (lanes_target // 128) * 128)
    else:
        # Small rows: fold several batch rows into one tile, full spatial extent.
        desired_rows = max(1, target_tile_bytes // row_full_bytes)
        t_n = _largest_divisor_leq(N, desired_rows)
        t_s = HW
    num_s = pl.cdiv(HW, t_s)
    needs_mask = (HW % t_s) != 0

    # Fixed-width accumulator, decoupled from t_s.
    if t_s <= 512:
        acc_lanes = t_s
    elif t_s % 512 == 0:
        acc_lanes = 512
    elif t_s % 256 == 0:
        acc_lanes = 256
    elif t_s % 128 == 0:
        acc_lanes = 128
    else:
        acc_lanes = 512      # ragged tail handled in-kernel (single-chunk case)

    # ---- VMEM limit: 2x double-buffered x tile + acc + out + headroom --------
    x_block_bytes = t_n * C * t_s * bpe
    acc_bytes = t_n * C * acc_lanes * 4
    out_bytes = 2 * t_n * C * 4
    vmem_limit = int(min(vmem_budget_cap,
                         max(16 * 1024 * 1024,
                             2 * x_block_bytes + acc_bytes + out_bytes
                             + 4 * 1024 * 1024)))

    cost = pl.CostEstimate(
        flops=int(N * C * HW),
        transcendentals=0,
        bytes_accessed=int(x_flat.size * bpe + N * C * 4),
    )

    pool = functools.partial(_pool_kernel, hw=HW, t_s=t_s,
                             acc_lanes=acc_lanes, needs_mask=needs_mask)

    pooled = pl.pallas_call(
        pool,
        out_shape=jax.ShapeDtypeStruct((N, 1, C), jnp.float32),
        grid_spec=pltpu.PrefetchScalarGridSpec(
            num_scalar_prefetch=0,
            grid=(N // t_n, num_s),
            in_specs=[pl.BlockSpec((t_n, C, t_s), lambda b, s: (b, 0, s))],
            out_specs=pl.BlockSpec((t_n, 1, C), lambda b, s: (b, 0, 0)),
            scratch_shapes=[pltpu.VMEM((t_n, C, acc_lanes), jnp.float32)],
        ),
        compiler_params=pltpu.CompilerParams(
            dimension_semantics=("parallel", "arbitrary"),
            vmem_limit_bytes=vmem_limit,
        ),
        cost_estimate=cost,
    )(x_flat)

    # Tiny second kernel: whole (N, C) batch through the excitation MLP at once.
    gate = pl.pallas_call(
        _mlp_kernel,
        out_shape=jax.ShapeDtypeStruct((N, C), x.dtype),
    )(pooled.reshape(N, C), w1, b1, w2, b2)

    return gate.reshape(N, C, 1, 1)


def _reference(x, w1, b1, w2, b2):
    # pure-JAX reference of the same math, for a sanity check
    s = jnp.mean(x, axis=(2, 3))
    h = s @ w1 + b1
    h = h * jax.nn.sigmoid(h)
    z = h @ w2 + b2
    z = jax.nn.sigmoid(z)
    return z.reshape(x.shape[0], x.shape[1], 1, 1)


if __name__ == "__main__":
    # Small, deterministic setup: SEBlock(in_channels=8, reduction_ratio=4)
    N, C, H, W = 2, 8, 16, 16
    Cr = C // 4

    key = jax.random.PRNGKey(0)
    kx, k1, k2, k3, k4 = jax.random.split(key, 5)

    x = jax.random.normal(kx, (N, C, H, W), dtype=jnp.float32)

    # Deterministic "PyTorch-Linear-like" init (uniform +/- 1/sqrt(fan_in)),
    # stored as (in, out) so the kernels do a plain matmul.
    lim1 = 1.0 / jnp.sqrt(jnp.float32(C))
    w1 = jax.random.uniform(k1, (C, Cr), jnp.float32, -lim1, lim1)
    b1 = jax.random.uniform(k2, (1, Cr), jnp.float32, -lim1, lim1)
    lim2 = 1.0 / jnp.sqrt(jnp.float32(Cr))
    w2 = jax.random.uniform(k3, (Cr, C), jnp.float32, -lim2, lim2)
    b2 = jax.random.uniform(k4, (1, C), jnp.float32, -lim2, lim2)

    out = se_block(x, w1, b1, w2, b2)
    out = jax.block_until_ready(out)

    ref = _reference(x, w1, b1, w2, b2)
    assert out.shape == (N, C, 1, 1), out.shape
    assert jnp.allclose(out, ref, atol=1e-5, rtol=1e-5), "mismatch vs reference"

    print("KERNEL_OK")
</pallas_src>

<mosaic_0001>
module attributes {stable_mosaic.version = 11 : i64} {
  func.func @_pool_kernel(%arg0: i32, %arg1: i32, %arg2: memref<2x8x256xf32, #tpu.memory_space<vmem>>, %arg3: memref<2x1x8xf32, #tpu.memory_space<vmem>>, %arg4: memref<2x8x256xf32, #tpu.memory_space<vmem>>) attributes {dimension_semantics = [#tpu.dimension_semantics<parallel>, #tpu.dimension_semantics<arbitrary>], iteration_bounds = array<i64: 1, 1>, scalar_prefetch = 0 : i64, scratch_operands = 1 : i64, tpu.core_type = #tpu.core_type<tc>, window_params = [{transform_indices = @transform_0, window_bounds = array<i64: 2, 8, 256>}, {transform_indices = @transform_1, window_bounds = array<i64: 2, 1, 8>}]} {
    %c0_i32 = arith.constant 0 : i32
    %0 = arith.cmpi eq, %arg1, %c0_i32 : i32
    %1 = arith.extui %0 : i1 to i32
    %c0_i32_0 = arith.constant 0 : i32
    %2 = arith.cmpi ne, %1, %c0_i32_0 : i32
    scf.if %2 {
      %cst = arith.constant 0.000000e+00 : f32
      %10 = vector.broadcast %cst : f32 to vector<2x8x256xf32>
      %c0_11 = arith.constant 0 : index
      %c0_12 = arith.constant 0 : index
      %c0_13 = arith.constant 0 : index
      %11 = vector.load %arg4[%c0_11, %c0_12, %c0_13] : memref<2x8x256xf32, #tpu.memory_space<vmem>>, vector<2x8x256xf32>
      tpu.vector_store %arg4[%c0_11, %c0_12, %c0_13], %10 {strides = array<i32>} : memref<2x8x256xf32, #tpu.memory_space<vmem>>, vector<2x8x256xf32>,
    } else {
    }
    %c0 = arith.constant 0 : index
    %c0_1 = arith.constant 0 : index
    %c0_2 = arith.constant 0 : index
    %3 = vector.load %arg2[%c0, %c0_1, %c0_2] : memref<2x8x256xf32, #tpu.memory_space<vmem>>, vector<2x8x256xf32>
    %c0_3 = arith.constant 0 : index
    %c0_4 = arith.constant 0 : index
    %c0_5 = arith.constant 0 : index
    %4 = vector.load %arg4[%c0_3, %c0_4, %c0_5] : memref<2x8x256xf32, #tpu.memory_space<vmem>>, vector<2x8x256xf32>
    %5 = arith.addf %4, %3 : vector<2x8x256xf32>
    %c0_6 = arith.constant 0 : index
    %c0_7 = arith.constant 0 : index
    %c0_8 = arith.constant 0 : index
    %6 = vector.load %arg4[%c0_6, %c0_7, %c0_8] : memref<2x8x256xf32, #tpu.memory_space<vmem>>, vector<2x8x256xf32>
    tpu.vector_store %arg4[%c0_6, %c0_7, %c0_8], %5 {strides = array<i32>} : memref<2x8x256xf32, #tpu.memory_space<vmem>>, vector<2x8x256xf32>,
    %c0_i32_9 = arith.constant 0 : i32
    %7 = arith.cmpi eq, %arg1, %c0_i32_9 : i32
    %8 = arith.extui %7 : i1 to i32
    %c0_i32_10 = arith.constant 0 : i32
    %9 = arith.cmpi ne, %8, %c0_i32_10 : i32
    scf.if %9 {
      %c0_11 = arith.constant 0 : index
      %c0_12 = arith.constant 0 : index
      %c0_13 = arith.constant 0 : index
      %10 = vector.load %arg4[%c0_11, %c0_12, %c0_13] : memref<2x8x256xf32, #tpu.memory_space<vmem>>, vector<2x8x256xf32>
      %cst = arith.constant dense<0.000000e+00> : vector<2x8xf32>
      %11 = vector.multi_reduction <add>, %10, %cst [2] : vector<2x8x256xf32> to vector<2x8xf32>
      %cst_14 = arith.constant 3.906250e-03 : f32
      %12 = vector.broadcast %cst_14 : f32 to vector<2x8xf32>
      %13 = arith.mulf %11, %12 : vector<2x8xf32>
      %14 = vector.shape_cast %13 : vector<2x8xf32> to vector<2x1x8xf32>
      %c0_15 = arith.constant 0 : index
      %c0_16 = arith.constant 0 : index
      %c0_17 = arith.constant 0 : index
      %15 = vector.load %arg3[%c0_15, %c0_16, %c0_17] : memref<2x1x8xf32, #tpu.memory_space<vmem>>, vector<2x1x8xf32>
      tpu.vector_store %arg3[%c0_15, %c0_16, %c0_17], %14 {strides = array<i32>} : memref<2x1x8xf32, #tpu.memory_space<vmem>>, vector<2x1x8xf32>,
    } else {
    }
    return
  }
  func.func @transform_0(%arg0: i32, %arg1: i32) -> (i32, i32, i32) {
    %c0_i32 = arith.constant 0 : i32
    %c0_i32_0 = arith.constant 0 : i32
    return %arg0, %c0_i32, %arg1 : i32, i32, i32
  }
  func.func @transform_1(%arg0: i32, %arg1: i32) -> (i32, i32, i32) {
    %c0_i32 = arith.constant 0 : i32
    %c0_i32_0 = arith.constant 0 : i32
    %c0_i32_1 = arith.constant 0 : i32
    return %arg0, %c0_i32, %c0_i32_0 : i32, i32, i32
  }
}

</mosaic_0001>

<bundles_post_ra>
// kernel: tpu_custom_call.1
= control target key start
LH: loop header
LB: loop body
LE: loop exit
PB: predicated region body
PF: predicated region fallthrough
CT: control target
= control target key end

     0   :  { %6 = vsyncpa [#allocation4], 0  ;;  %s175_s0 = inlined_call_operand.hbm [shape: f32[2,8,256], index: 0, kind: input, shape index: {}]   ;;  %s176_s1 = inlined_call_operand.hbm [shape: f32[2,1,8], index: 1, kind: output, shape index: {}]  }
   0x1   :  { %7 = vsyncpa [#allocation5], 0  ;;  %s12_s8 = sshll.u32 %s175_s0, 4  ;;  %s151_s9 = smov [#allocation3]   ;;  %s13_s8 = int_to_ptr.hbm [resolvable:$true] %s12_s8 }
   0x2   :  { %s14_s10 = sshll.u32 %s151_s9, 4  ;;  %s152_s11 = smov 256   ;;  %s15_s10 = int_to_ptr.vmem [resolvable:$true] %s14_s10 }
   0x3   :  { %s153_s12 = smov 16  }
   0x4   :  { %20 = dma.hbm_to_vmem [thread:$0]  %s13_s8, 512, %s15_s10, [#allocation4], %s152_s11, %s152_s11, %s153_s12  }
   0x5   :  { %147 = dma.done.wait [#allocation4], 512  }
   0x6   :  { %148 = vsyncadd [#allocation4], 4294966784  ;;  %v33_v0 = vld [vmem:[#allocation3] sm:$0xff]  ;;  %v34_v1 = vld [vmem:[#allocation3 + $0x8] sm:$0xff]  ;;  %v66_v6 = vlaneseq  ;;  %vm72_vm0 = vcmask 57344   ;;  %s154_s0 = smov [#allocation6]  }
   0x7   :  { %v56_v2 = vadd.f32 %v34_v1, %v33_v0  ;;  %v35_v3 = vld [vmem:[#allocation3 + $0x10] sm:$0xff]  ;;  %v36_v4 = vld [vmem:[#allocation3 + $0x18] sm:$0xff]  ;;  %s79_s13 = sshll.u32 %s154_s0, 4  ;;  %s81_s16 = sshll.u32 %s176_s1, 4  ;;  %s80_s13 = int_to_ptr.vmem [resolvable:$true] %s79_s13  ;;  %s82_s16 = int_to_ptr.hbm [resolvable:$true] %s81_s16 }
   0x8   :  { %v59_v5 = vadd.f32 %v36_v4, %v35_v3  ;;  %v67_v7 = vand.u32 127, %v66_v6  ;;  %s155_s17 = smov 1  }
   0x9   :  { %57 = vadd.xlane.f32.xlu0 %v56_v2 }
  0x11   :  { %60 = vadd.xlane.f32.xlu0 %v59_v5 }
  0x7c   :  { %v58_v8 = vpop.xlane.xlu0 %57 }
  0x7d   :  { %v62_v9 = vmul.f32 0.00390625, %v58_v8 }
  0x7f   :  { %v68_v10 = vperm.slane %v62_v9, %v67_v7 }
  0x81   :  { %73 = vst.msk [vmem:[#allocation6] sm:$0x1] %vm72_vm0, %v68_v10 }
  0x84   :  { %v61_v11 = vpop.xlane.xlu0 %60 }
  0x85   :  { %v63_v12 = vmul.f32 0.00390625, %v61_v11 }
  0x87   :  { %v69_v13 = vperm.slane %v63_v12, %v67_v7 }
  0x89   :  { %74 = vst.msk [vmem:[#allocation6 + $0x1] sm:$0x1] %vm72_vm0, %v69_v13 }
  0x8a   :  { %87 = dma.vmem_to_hbm [thread:$0]  %s80_s13, 32, %s82_s16, [#allocation5], %s153_s12, %s153_s12, %s155_s17  }
  0x8b   :  { %149 = dma.done.wait [#allocation5], 32  }
  0x8c   :  { %150 = vsyncadd [#allocation5], 4294967264 }
  0x8d   :  { %92 = vsyncpa [#allocation4], 1 }
  0x8e   :  { %93 = vsyncpa [#allocation5], 1 }

</bundles_post_ra>
